<compile_context>
chip_gen: v7x
topology: tpu7x:2x2x1
jax: 0.10.0
libtpu: 0.0.40
codegen_flags: <defaults>
</compile_context>

<pallas_src>
import jax
import jax.numpy as jnp
from jax import lax
from jax.experimental import pallas as pl
from jax.experimental.pallas import tpu as pltpu


def _round_up(x, m):
    return ((x + m - 1) // m) * m


def _choose_block_b(B, requested=None):
    """Pick a batch tile: either the full (padded) batch or a multiple of 128."""
    if requested is not None:
        blk = min(int(requested), B)
    else:
        blk = min(B, 1024)
        if B > 2048:
            blk = 1024
        elif B > 256:
            # aim for >= 2 grid steps (v7x megacore) while staying lane-dense
            blk = max(128, ((B // 2) // 128) * 128)
    if blk >= B:
        return B                      # single tile: block dims == array dims
    # tiled path: the last output dim must be a multiple of 128 (unmasked vst)
    blk = max(128, (blk // 128) * 128)
    if blk >= B:
        return B
    return blk


def categorical_kernel(x_ref, wt_ref, bt_ref, logits_ref, probs_ref):
    x = x_ref[...]                                   # (Bt, Din) f32
    wt = wt_ref[...]                                 # (K, Din)  f32

    # raw^T = W^T @ x^T  -> (K, Bt); contraction over Din on both last axes
    # (MXU dot with transposed RHS), batch on the 128-lane axis.
    raw = lax.dot_general(
        wt, x,
        dimension_numbers=(((1,), (1,)), ((), ())),
        preferred_element_type=jnp.float32,
    ) + bt_ref[...]                                  # + (K, 1) bias

    # numerically stable softmax / log-softmax, reducing over the K sublanes
    m = jnp.max(raw, axis=0, keepdims=True)          # (1, Bt)
    z = raw - m
    e = jnp.exp(z)
    s = jnp.sum(e, axis=0, keepdims=True)            # (1, Bt)
    inv = 1.0 / s                                    # one divide per column

    # torch.distributions.Categorical parameterization:
    #   .logits = raw - logsumexp(raw)   ;   .probs = softmax(raw)
    logits_ref[...] = z - jnp.log(s)
    probs_ref[...] = e * inv


def categorical_module_forward(x, w, b, *, block_b=None):
    """Pallas forward: returns (normalized_logits, probs) of Categorical(logits = x@w + b)."""
    B, Din = x.shape
    K = w.shape[1]

    blk = _choose_block_b(B, block_b)
    B_pad = _round_up(B, blk)
    if B_pad != B:
        x = jnp.pad(x, ((0, B_pad - B), (0, 0)))     # zero rows, sliced off below

    wt = w.T                                         # (K, Din) — tiny transpose
    bt = jnp.reshape(b, (1, K)).T                    # (K, 1)

    grid = (B_pad // blk,)

    # VMEM budget: double-buffered x tiles + resident W^T/bias + 2 double-buffered outputs.
    din_p = _round_up(Din, 128)
    k_p = _round_up(K, 8)
    est_bytes = (2 * blk * din_p + 2 * k_p * din_p + 2 * k_p * 128
                 + 2 * 2 * k_p * max(blk, 128)) * 4
    vmem_limit = int(min(max(32 << 20, 2 * est_bytes), 64 << 20))

    cost = pl.CostEstimate(
        flops=2 * B_pad * Din * K,
        transcendentals=2 * B_pad * K,
        bytes_accessed=4 * (B_pad * Din + Din * K + K + 2 * B_pad * K),
    )

    logits_t, probs_t = pl.pallas_call(
        categorical_kernel,
        out_shape=(
            jax.ShapeDtypeStruct((K, B_pad), jnp.float32),
            jax.ShapeDtypeStruct((K, B_pad), jnp.float32),
        ),
        grid=grid,
        in_specs=[
            pl.BlockSpec((blk, Din), lambda i: (i, 0)),   # x tile, streamed over batch
            pl.BlockSpec((K, Din), lambda i: (0, 0)),     # W^T, resident
            pl.BlockSpec((K, 1), lambda i: (0, 0)),       # bias, resident
        ],
        out_specs=(
            pl.BlockSpec((K, blk), lambda i: (0, i)),     # lane-dense (batch on lanes)
            pl.BlockSpec((K, blk), lambda i: (0, i)),
        ),
        compiler_params=pltpu.CompilerParams(
            dimension_semantics=("parallel",),
            vmem_limit_bytes=vmem_limit,
        ),
        cost_estimate=cost,
    )(x, wt, bt)

    # back to the (B, K) layout of the reference module (drop batch padding)
    logits = logits_t.T[:B]
    probs = probs_t.T[:B]
    return logits, probs


def init_params(key, num_inputs, num_outputs):
    """Deterministic PyTorch-Linear-style init: U(-1/sqrt(fan_in), 1/sqrt(fan_in))."""
    k1, k2 = jax.random.split(key)
    bound = 1.0 / jnp.sqrt(jnp.float32(num_inputs))
    w = jax.random.uniform(k1, (num_inputs, num_outputs), jnp.float32, -bound, bound)
    b = jax.random.uniform(k2, (1, num_outputs), jnp.float32, -bound, bound)
    return w, b


def _reference(x, w, b):
    raw = x @ w + b
    logits = raw - jax.scipy.special.logsumexp(raw, axis=-1, keepdims=True)
    probs = jax.nn.softmax(raw, axis=-1)
    return logits, probs


if __name__ == "__main__":
    key = jax.random.PRNGKey(0)
    kx, kp, kx2 = jax.random.split(key, 3)

    # TODO(synk): torch.distributions.Categorical object construction has no
    # Pallas equivalent; we return its parameters (normalized logits, probs).

    # small shape consistent with the module (batch, num_inputs, num categories)
    B, Din, K = 16, 32, 8
    x = jax.random.normal(kx, (B, Din), jnp.float32)
    w, b = init_params(kp, Din, K)

    fwd = jax.jit(categorical_module_forward)
    logits, probs = fwd(x, w, b)
    jax.block_until_ready((logits, probs))

    ref_logits, ref_probs = _reference(x, w, b)
    assert logits.shape == (B, K) and probs.shape == (B, K)
    assert jnp.allclose(logits, ref_logits, atol=1e-5)
    assert jnp.allclose(probs, ref_probs, atol=1e-5)
    assert jnp.allclose(jnp.sum(probs, axis=-1), 1.0, atol=1e-5)

    # second config exercising the tiled + padded (B not divisible) path
    B2 = 300
    x2 = jax.random.normal(kx2, (B2, Din), jnp.float32)
    logits2, probs2 = jax.jit(categorical_module_forward)(x2, w, b)
    jax.block_until_ready((logits2, probs2))
    ref_logits2, ref_probs2 = _reference(x2, w, b)
    assert logits2.shape == (B2, K) and probs2.shape == (B2, K)
    assert jnp.allclose(logits2, ref_logits2, atol=1e-5)
    assert jnp.allclose(probs2, ref_probs2, atol=1e-5)
    assert jnp.allclose(jnp.sum(probs2, axis=-1), 1.0, atol=1e-5)

    print("KERNEL_OK")
</pallas_src>

<mosaic_0001>
module attributes {stable_mosaic.version = 11 : i64} {
  func.func @categorical_kernel(%arg0: i32, %arg1: memref<16x32xf32, #tpu.memory_space<vmem>>, %arg2: memref<8x32xf32, #tpu.memory_space<vmem>>, %arg3: memref<8x1xf32, #tpu.memory_space<vmem>>, %arg4: memref<8x16xf32, #tpu.memory_space<vmem>>, %arg5: memref<8x16xf32, #tpu.memory_space<vmem>>) attributes {dimension_semantics = [#tpu.dimension_semantics<parallel>], iteration_bounds = array<i64: 1>, scalar_prefetch = 0 : i64, scratch_operands = 0 : i64, tpu.core_type = #tpu.core_type<tc>, window_params = [{transform_indices = @transform_0, window_bounds = array<i64: 16, 32>}, {pipeline_mode = #tpu.pipeline_mode<synchronous>, transform_indices = @transform_1, window_bounds = array<i64: 8, 32>}, {pipeline_mode = #tpu.pipeline_mode<synchronous>, transform_indices = @transform_2, window_bounds = array<i64: 8, 1>}, {transform_indices = @transform_3, window_bounds = array<i64: 8, 16>}, {transform_indices = @transform_4, window_bounds = array<i64: 8, 16>}]} {
    %c0 = arith.constant 0 : index
    %c0_0 = arith.constant 0 : index
    %0 = vector.load %arg1[%c0, %c0_0] : memref<16x32xf32, #tpu.memory_space<vmem>>, vector<16x32xf32>
    %c0_1 = arith.constant 0 : index
    %c0_2 = arith.constant 0 : index
    %1 = vector.load %arg2[%c0_1, %c0_2] : memref<8x32xf32, #tpu.memory_space<vmem>>, vector<8x32xf32>
    %cst = arith.constant dense<0.000000e+00> : vector<8x16xf32>
    %2 = tpu.matmul %1, %0, %cst {dimension_numbers = #tpu.dot_dimension_numbers<[1], [1], [0], [0], [0, 0, 1, 0], [], []>} : vector<8x32xf32>, vector<16x32xf32>, vector<8x16xf32> -> vector<8x16xf32>
    %c0_3 = arith.constant 0 : index
    %c0_4 = arith.constant 0 : index
    %3 = vector.load %arg3[%c0_3, %c0_4] : memref<8x1xf32, #tpu.memory_space<vmem>>, vector<8x1xf32>
    %4 = vector.broadcast %3 : vector<8x1xf32> to vector<8x16xf32>
    %5 = arith.addf %2, %4 : vector<8x16xf32>
    %cst_5 = arith.constant dense<0xFF800000> : vector<16xf32>
    %6 = vector.multi_reduction <maximumf>, %5, %cst_5 [0] : vector<8x16xf32> to vector<16xf32>
    %7 = vector.shape_cast %6 : vector<16xf32> to vector<1x16xf32>
    %8 = vector.broadcast %7 : vector<1x16xf32> to vector<8x16xf32>
    %9 = arith.subf %5, %8 : vector<8x16xf32>
    %10 = math.exp %9 : vector<8x16xf32>
    %cst_6 = arith.constant dense<0.000000e+00> : vector<16xf32>
    %11 = vector.multi_reduction <add>, %10, %cst_6 [0] : vector<8x16xf32> to vector<16xf32>
    %12 = vector.shape_cast %11 : vector<16xf32> to vector<1x16xf32>
    %cst_7 = arith.constant 1.000000e+00 : f32
    %13 = vector.broadcast %cst_7 : f32 to vector<1x16xf32>
    %14 = arith.divf %13, %12 : vector<1x16xf32>
    %15 = math.log %12 : vector<1x16xf32>
    %16 = vector.broadcast %15 : vector<1x16xf32> to vector<8x16xf32>
    %17 = arith.subf %9, %16 : vector<8x16xf32>
    %c0_8 = arith.constant 0 : index
    %c0_9 = arith.constant 0 : index
    %18 = vector.load %arg4[%c0_8, %c0_9] : memref<8x16xf32, #tpu.memory_space<vmem>>, vector<8x16xf32>
    tpu.vector_store %arg4[%c0_8, %c0_9], %17 {strides = array<i32>} : memref<8x16xf32, #tpu.memory_space<vmem>>, vector<8x16xf32>,
    %19 = vector.broadcast %14 : vector<1x16xf32> to vector<8x16xf32>
    %20 = arith.mulf %10, %19 : vector<8x16xf32>
    %c0_10 = arith.constant 0 : index
    %c0_11 = arith.constant 0 : index
    %21 = vector.load %arg5[%c0_10, %c0_11] : memref<8x16xf32, #tpu.memory_space<vmem>>, vector<8x16xf32>
    tpu.vector_store %arg5[%c0_10, %c0_11], %20 {strides = array<i32>} : memref<8x16xf32, #tpu.memory_space<vmem>>, vector<8x16xf32>,
    return
  }
  func.func @transform_0(%arg0: i32) -> (i32, i32) {
    %c0_i32 = arith.constant 0 : i32
    %c0_i32_0 = arith.constant 0 : i32
    return %arg0, %c0_i32 : i32, i32
  }
  func.func @transform_1(%arg0: i32) -> (i32, i32) {
    %c0_i32 = arith.constant 0 : i32
    %c0_i32_0 = arith.constant 0 : i32
    %c0_i32_1 = arith.constant 0 : i32
    return %c0_i32, %c0_i32_0 : i32, i32
  }
  func.func @transform_2(%arg0: i32) -> (i32, i32) {
    %c0_i32 = arith.constant 0 : i32
    %c0_i32_0 = arith.constant 0 : i32
    %c0_i32_1 = arith.constant 0 : i32
    return %c0_i32, %c0_i32_0 : i32, i32
  }
  func.func @transform_3(%arg0: i32) -> (i32, i32) {
    %c0_i32 = arith.constant 0 : i32
    %c0_i32_0 = arith.constant 0 : i32
    return %c0_i32, %arg0 : i32, i32
  }
  func.func @transform_4(%arg0: i32) -> (i32, i32) {
    %c0_i32 = arith.constant 0 : i32
    %c0_i32_0 = arith.constant 0 : i32
    return %c0_i32, %arg0 : i32, i32
  }
}

</mosaic_0001>

<bundles_post_ra>
// kernel: categorical_module_forward.1
= control target key start
LH: loop header
LB: loop body
LE: loop exit
PB: predicated region body
PF: predicated region fallthrough
CT: control target
= control target key end

     0   :  { %10 = vsyncpa [#allocation3], 0  ;;  %s365_s0 = inlined_call_operand.vmem [shape: f32[16,32], index: 0, kind: input, shape index: {}]   ;;  %s366_s1 = inlined_call_operand.hbm [shape: f32[8,32], index: 1, kind: input, shape index: {}]   ;;  %s367_s2 = inlined_call_operand.vmem [shape: f32[8,1], index: 2, kind: input, shape index: {}]   ;;  %s368_s3 = inlined_call_operand.hbm [shape: f32[8,16], index: 3, kind: output, shape index: {0}]   ;;  %s369_s4 = inlined_call_operand.hbm [shape: f32[8,16], index: 4, kind: output, shape index: {1}]  }
   0x1   :  { %11 = vsyncpa [#allocation4], 0 }
   0x2   :  { %12 = vsyncpa [#allocation7], 0  ;;  %s277_s15 = smov [#allocation2]   ;;  %s205_s19 = scalar_lea.hbm %s366_s1, 128 }
   0x3   :  { %s21_s16 = sshll.u32 %s277_s15, 4  ;;  %p206_p0 = scmp.ne.s32.totalorder %s366_s1, %s205_s19  ;;  %s22_s16 = int_to_ptr.vmem [resolvable:$true] %s21_s16 }
   0x4   :  { %p209_p1 = scmp.lt.u32.totalorder %s205_s19, %s366_s1 }
   0x6   :  { %p211_p2 = pnand %p209_p1, %p206_p0 }
   0x8   :  { %214 = shalt.err (!%p211_p2)
}
   0x9   :  { %s215_s24 = scalar_lea.vmem %s22_s16, 128  ;;  %p220_p4 = scmp.lt.s32.totalorder %s22_s16, %s22_s16 }
   0xa   :  { %p216_p3 = scmp.ne.s32.totalorder %s22_s16, %s215_s24  ;;  %p221_p5 = scmp.lt.s32.totalorder %s215_s24, %s215_s24 }
   0xc   :  { %p222_p6 = por %p221_p5, %p220_p4 }
   0xe   :  { %p223_p7 = pnand %p222_p6, %p216_p3 }
  0x10   :  { %226 = shalt.err (!%p223_p7)
}
  0x11   :  { %24 = dma.hbm_to_vmem [thread:$0]  %s366_s1, 128, %s22_s16, [#allocation3]  }
  0x12   :  { %271 = dma.done.wait [#allocation3], 128  }
  0x13   :  { %272 = vsyncadd [#allocation3], 4294967168  ;;  %v278_v0 = vmov 0.0|0.0   ;;  %vm279_vm0 = vmmov 0   ;;  %v280_v1 = vmov 0.0   ;;  %v281_v2 = vmov 0  }
  0x14   :  { %187 = vmatprep.subr.bf16.mxu0 %v278_v0  ;;  %184 = vmatprep.mubr.msk.f32.mxu0 %vm279_vm0, %v280_v1  ;;  %vm39_vm1 = vcmask 261120   ;;  %v30_v3 = vld [vmem:[%s365_s0] sm:$0xff]  ;;  %v31_v4 = vld [vmem:[%s365_s0 + $0x8] sm:$0xff]  ;;  %vm119_vm3 = vcmask 130048   ;;  %s282_s0 = smov [#allocation6]   ;;  %s283_s6 = smov [#allocation5]  }
  0x15   :  { %198 = vset.pattern.permute.xlu0 %v281_v2  ;;  %vm189_vm2 = vmpackc.low %vm39_vm1, %vm39_vm1  ;;  %v188_v5 = vpack.c.bf16 %v31_v4, %v30_v3  ;;  %v33_v6 = vld [vmem:[%s367_s2] sm:$0xff]  ;;  %s161_s2 = sshll.u32 %s282_s0, 4  ;;  %s151_s7 = sshll.u32 %s283_s6, 4  ;;  %s162_s2 = int_to_ptr.vmem [resolvable:$true] %s161_s2  ;;  %s332_s7 = int_to_ptr.vmem [resolvable:$true] %s151_s7 }
  0x16   :  { %36 = vperm.xlu0 %198, %v33_v6   ;;  %v32_v7 = vld [vmem:[#allocation2] sm:$0xff]  ;;  %s227_s8 = scalar_lea.vmem %s162_s2, 128  ;;  %p232_p9 = scmp.lt.s32.totalorder %s162_s2, %s162_s2 }
  0x17   :  { %190 = vmatpush3.bf16.xpose.msk.msra.mxu0 %vm189_vm2, %v188_v5  ;;  %p228_p8 = scmp.ne.s32.totalorder %s162_s2, %s227_s8  ;;  %p233_p10 = scmp.lt.s32.totalorder %s227_s8, %s227_s8 }
  0x19   :  { %p234_p11 = por %p233_p10, %p232_p9 }
  0x1b   :  { %p235_p12 = pnand %p234_p11, %p228_p8 }
  0x1e   :  { %185 = vmatmul.mubr.msk.f32.vlgmr.msra.gmra.mrb[0].mxu0 %vm39_vm1, %v32_v7 }
  0x95   :  { %v37_v8 = vpop.permute.xlu0 %36 }
  0xf1   :  { %v115_v9 = vpop.f32.mrb[0].mxu0 }
  0xf2   :  { %v116_v10 = vadd.f32 %v115_v9, %v37_v8  ;;  %v186_v11 = vpop.f32.mrb[1].mxu0 }
  0xf4   :  { %v120_v12 = vsel %vm119_vm3, %v116_v10, -inf }
  0xf5   :  { %v121_v13 = vrot.slane %v120_v12, 4 }
  0xf7   :  { %v122_v14 = vmax.f32 %v120_v12, %v121_v13 }
  0xf9   :  { %v123_v15 = vrot.slane %v122_v14, 2 }
  0xfb   :  { %v124_v16 = vmax.f32 %v122_v14, %v123_v15 }
  0xfd   :  { %v125_v17 = vrot.slane %v124_v16, 1 }
  0xff   :  { %v126_v18 = vmax.f32 %v124_v16, %v125_v17 }
 0x101   :  { %v127_v19 = vsub.f32 %v116_v10, %v126_v18 }
 0x103   :  { %v128_v20 = vmul.f32 1.442695, %v127_v19 }
 0x105   :  { %199 = vpow2.f32 %v128_v20 }
 0x10f   :  { %v200_v21 = vpop.eup %199 }
 0x110   :  { %v130_v22 = vsel %vm119_vm3, %v200_v21, 0.0 }
 0x111   :  { %v131_v23 = vrot.slane %v130_v22, 4 }
 0x113   :  { %v132_v24 = vadd.f32 %v131_v23, %v130_v22 }
 0x115   :  { %v133_v25 = vrot.slane %v132_v24, 2 }
 0x117   :  { %v134_v26 = vadd.f32 %v133_v25, %v132_v24 }
 0x119   :  { %v135_v27 = vrot.slane %v134_v26, 1 }
 0x11b   :  { %v136_v28 = vadd.f32 %v135_v27, %v134_v26 }
 0x11d   :  { %201 = vrcp.f32 %v136_v28 }
 0x11e   :  { %203 = vlog2.f32 %v136_v28 }
 0x127   :  { %v202_v29 = vpop.eup %201 }
 0x128   :  { %v204_v30 = vpop.eup %203  ;;  %v143_v31 = vmul.f32 %v202_v29, %v200_v21 }
 0x129   :  { %v140_v32 = vmul.f32 0.6931472, %v204_v30 }
 0x12a   :  { %144 = vst.msk [vmem:[#allocation6] sm:$0xff] %vm119_vm3, %v143_v31 }
 0x12b   :  { %v141_v33 = vsub.f32 %v127_v19, %v140_v32 }
 0x12c   :  { %238 = shalt.err (!%p235_p12)
}
 0x12d   :  { %s239_s11 = scalar_lea.hbm %s369_s4, 128 }
 0x12e   :  { %p240_p13 = scmp.ne.s32.totalorder %s369_s4, %s239_s11  ;;  %p243_p0 = scmp.lt.u32.totalorder %s239_s11, %s369_s4 }
 0x130   :  { %p245_p1 = pnand %p243_p0, %p240_p13 }
 0x132   :  { %248 = shalt.err (!%p245_p1)
}
 0x133   :  { %164 = dma.vmem_to_hbm [thread:$0]  %s162_s2, 128, %s369_s4, [#allocation7]   ;;  %142 = vst.msk [vmem:[#allocation5] sm:$0xff] %vm119_vm3, %v141_v33 }
 0x134   :  { %s249_s18 = scalar_lea.vmem %s332_s7, 128  ;;  %p254_p3 = scmp.lt.s32.totalorder %s332_s7, %s332_s7 }
 0x135   :  { %p250_p2 = scmp.ne.s32.totalorder %s332_s7, %s249_s18  ;;  %p255_p4 = scmp.lt.s32.totalorder %s249_s18, %s249_s18 }
 0x137   :  { %p256_p5 = por %p255_p4, %p254_p3 }
 0x139   :  { %p257_p6 = pnand %p256_p5, %p250_p2 }
 0x13b   :  { %260 = shalt.err (!%p257_p6)
}
 0x13c   :  { %s261_s21 = scalar_lea.hbm %s368_s3, 128 }
 0x13d   :  { %p262_p7 = scmp.ne.s32.totalorder %s368_s3, %s261_s21  ;;  %p265_p8 = scmp.lt.u32.totalorder %s261_s21, %s368_s3 }
 0x13f   :  { %p267_p9 = pnand %p265_p8, %p262_p7 }
 0x141   :  { %270 = shalt.err (!%p267_p9)
}
 0x142   :  { %154 = dma.vmem_to_hbm [thread:$0]  %s332_s7, 128, %s368_s3, [#allocation4]  }
 0x143   :  { %273 = dma.done.wait [#allocation4], 128  }
 0x144   :  { %274 = vsyncadd [#allocation4], 4294967168 }
 0x145   :  { %275 = dma.done.wait [#allocation7], 128  }
 0x146   :  { %276 = vsyncadd [#allocation7], 4294967168 }
 0x147   :  { %171 = vsyncpa [#allocation3], 1 }
 0x148   :  { %172 = vsyncpa [#allocation4], 1 }
 0x149   :  { %173 = vsyncpa [#allocation7], 1 }

</bundles_post_ra>
